<compile_context>
chip_gen: v7x
topology: tpu7x:2x2x1
jax: 0.10.0
libtpu: 0.0.40
codegen_flags: <defaults>
</compile_context>

<pallas_src>
import functools

import jax
import jax.numpy as jnp
from jax.experimental import pallas as pl
from jax.experimental.pallas import tpu as pltpu


def _round_up(x, m):
    return (x + m - 1) // m * m


def _actor_critic_kernel(
    x_ref, w1_ref, b1_ref, w2_ref, b2_ref, w3_ref, b3_ref, out_ref, *, hidden
):
    x = x_ref[...]

    # Fused first layer (policy | value share x): one MXU push, relu on both halves.
    z1 = jnp.dot(x, w1_ref[...], preferred_element_type=jnp.float32) + b1_ref[...]
    hv1 = jnp.maximum(z1, 0.0)

    # Fused second layer: block-diagonal weight keeps policy/value independent.
    # tanh on columns [0, H) (policy, EUP), relu elsewhere (value + zero pad, VPU).
    z2 = jnp.dot(hv1, w2_ref[...], preferred_element_type=jnp.float32) + b2_ref[...]
    col = jax.lax.broadcasted_iota(jnp.int32, z2.shape, dimension=1)
    hv2 = jnp.where(col < hidden, jnp.tanh(z2), jnp.maximum(z2, 0.0))

    # Fused heads -> one lane-dense (TB, 128) store: [mean cols | value col | zero pad].
    out_ref[...] = (
        jnp.dot(hv2, w3_ref[...], preferred_element_type=jnp.float32) + b3_ref[...]
    )


def fuse_params(params):
    """One-time fusion of the ActorCritic parameters into 3 lane-dense weight/bias pairs."""
    num_inputs, H = params["wp1"].shape
    A = params["wm"].shape[1]
    hp = _round_up(2 * H, 128)       # lane-dense fused hidden width
    n_pad = _round_up(A + 1, 128)    # lane-dense fused output width (mean | value | pad)

    w1 = jnp.zeros((num_inputs, hp), jnp.float32)
    w1 = w1.at[:, :H].set(params["wp1"]).at[:, H:2 * H].set(params["wv1"])
    b1 = jnp.zeros((1, hp), jnp.float32)
    b1 = b1.at[:, :H].set(params["bp1"]).at[:, H:2 * H].set(params["bv1"])

    w2 = jnp.zeros((hp, hp), jnp.float32)
    w2 = w2.at[:H, :H].set(params["wp2"]).at[H:2 * H, H:2 * H].set(params["wv2"])
    b2 = jnp.zeros((1, hp), jnp.float32)
    b2 = b2.at[:, :H].set(params["bp2"]).at[:, H:2 * H].set(params["bv2"])

    w3 = jnp.zeros((hp, n_pad), jnp.float32)
    w3 = w3.at[:H, :A].set(params["wm"]).at[H:2 * H, A].set(params["wh"][:, 0])
    b3 = jnp.zeros((1, n_pad), jnp.float32)
    b3 = b3.at[0, :A].set(params["bm"][0]).at[0, A].set(params["bh"][0, 0])

    fused = {"w1": w1, "b1": b1, "w2": w2, "b2": b2, "w3": w3, "b3": b3,
             "logstd": params["logstd"]}
    return fused, H, A


@functools.partial(jax.jit, static_argnames=("hidden", "num_actions"))
def actor_critic_forward(x, fused, *, hidden, num_actions):
    """Returns (value (B,1), action_mean (B,A)) from one fused Pallas kernel."""
    B, num_inputs = x.shape
    n_pad = fused["w3"].shape[1]

    # ---- Row-tiled batch grid (parallel axis; weights resident via constant maps) ----
    tb = min(512, _round_up(B, 8))
    b_pad = _round_up(B, tb)
    if b_pad != B:
        x = jnp.pad(x, ((0, b_pad - B), (0, 0)))
    grid = (b_pad // tb,)

    out = pl.pallas_call(
        functools.partial(_actor_critic_kernel, hidden=hidden),
        out_shape=jax.ShapeDtypeStruct((b_pad, n_pad), jnp.float32),
        grid=grid,
        in_specs=[
            pl.BlockSpec((tb, num_inputs), lambda i: (i, 0)),
            pl.BlockSpec(fused["w1"].shape, lambda i: (0, 0)),
            pl.BlockSpec(fused["b1"].shape, lambda i: (0, 0)),
            pl.BlockSpec(fused["w2"].shape, lambda i: (0, 0)),
            pl.BlockSpec(fused["b2"].shape, lambda i: (0, 0)),
            pl.BlockSpec(fused["w3"].shape, lambda i: (0, 0)),
            pl.BlockSpec(fused["b3"].shape, lambda i: (0, 0)),
        ],
        out_specs=pl.BlockSpec((tb, n_pad), lambda i: (i, 0)),
        compiler_params=pltpu.CompilerParams(
            dimension_semantics=("parallel",),
        ),
    )(x, fused["w1"], fused["b1"], fused["w2"], fused["b2"], fused["w3"], fused["b3"])

    A = num_actions
    mean = out[:B, :A]
    value = out[:B, A:A + 1]
    return value, mean


def make_params(key, num_inputs, hidden_size, num_outputs):
    """Deterministic synthetic init (stand-in for orthogonal init_relu/init_tanh/init_)."""
    ks = jax.random.split(key, 6)
    scale = 0.1

    def w(k, fan_in, fan_out):
        return scale * jax.random.normal(k, (fan_in, fan_out), jnp.float32)

    return {
        # policy base
        "wp1": w(ks[0], num_inputs, hidden_size),
        "bp1": jnp.zeros((1, hidden_size), jnp.float32),
        "wp2": w(ks[1], hidden_size, hidden_size),
        "bp2": jnp.zeros((1, hidden_size), jnp.float32),
        # DiagGaussian mean head
        "wm": w(ks[2], hidden_size, num_outputs),
        "bm": jnp.zeros((1, num_outputs), jnp.float32),
        # value base
        "wv1": w(ks[3], num_inputs, hidden_size),
        "bv1": jnp.zeros((1, hidden_size), jnp.float32),
        "wv2": w(ks[4], hidden_size, hidden_size),
        "bv2": jnp.zeros((1, hidden_size), jnp.float32),
        # value head
        "wh": w(ks[5], hidden_size, 1),
        "bh": jnp.zeros((1, 1), jnp.float32),
        # DiagGaussian logstd (AddBias on zeros) -> std = exp(0) = 1
        "logstd": jnp.zeros((num_outputs,), jnp.float32),
    }


def reference_forward(x, p):
    h = jnp.maximum(x @ p["wp1"] + p["bp1"], 0.0)
    h = jnp.tanh(h @ p["wp2"] + p["bp2"])
    mean = h @ p["wm"] + p["bm"]
    v = jnp.maximum(x @ p["wv1"] + p["bv1"], 0.0)
    v = jnp.maximum(v @ p["wv2"] + p["bv2"], 0.0)
    value = v @ p["wh"] + p["bh"]
    return value, mean


if __name__ == "__main__":
    B, NUM_INPUTS, HIDDEN, NUM_OUTPUTS = 8, 16, 32, 4

    key = jax.random.PRNGKey(0)
    k_obs, k_params = jax.random.split(key)
    obs = jax.random.normal(k_obs, (B, NUM_INPUTS), jnp.float32)
    params = make_params(k_params, NUM_INPUTS, HIDDEN, NUM_OUTPUTS)

    # One-time parameter fusion (off the forward-pass hot path).
    fused, H, A = fuse_params(params)

    value, action_mean = actor_critic_forward(obs, fused, hidden=H, num_actions=A)
    jax.block_until_ready((value, action_mean))

    value_ref, mean_ref = reference_forward(obs, params)
    assert value.shape == (B, 1) and action_mean.shape == (B, NUM_OUTPUTS)
    assert jnp.allclose(value, value_ref, atol=1e-5, rtol=1e-5)
    assert jnp.allclose(action_mean, mean_ref, atol=1e-5, rtol=1e-5)

    # std of the DiagGaussian (zero-initialized logstd bias), batch independent:
    std = jnp.exp(fused["logstd"])
    jax.block_until_ready(std)

    print("KERNEL_OK")
</pallas_src>

<mosaic_0001>
module attributes {stable_mosaic.version = 11 : i64} {
  func.func @_actor_critic_kernel(%arg0: i32, %arg1: memref<8x16xf32, #tpu.memory_space<vmem>>, %arg2: memref<16x128xf32, #tpu.memory_space<vmem>>, %arg3: memref<1x128xf32, #tpu.memory_space<vmem>>, %arg4: memref<128x128xf32, #tpu.memory_space<vmem>>, %arg5: memref<1x128xf32, #tpu.memory_space<vmem>>, %arg6: memref<128x128xf32, #tpu.memory_space<vmem>>, %arg7: memref<1x128xf32, #tpu.memory_space<vmem>>, %arg8: memref<8x128xf32, #tpu.memory_space<vmem>>) attributes {dimension_semantics = [#tpu.dimension_semantics<parallel>], iteration_bounds = array<i64: 1>, scalar_prefetch = 0 : i64, scratch_operands = 0 : i64, tpu.core_type = #tpu.core_type<tc>, window_params = [{transform_indices = @transform_0, window_bounds = array<i64: 8, 16>}, {pipeline_mode = #tpu.pipeline_mode<synchronous>, transform_indices = @transform_1, window_bounds = array<i64: 16, 128>}, {pipeline_mode = #tpu.pipeline_mode<synchronous>, transform_indices = @transform_2, window_bounds = array<i64: 1, 128>}, {pipeline_mode = #tpu.pipeline_mode<synchronous>, transform_indices = @transform_3, window_bounds = array<i64: 128, 128>}, {pipeline_mode = #tpu.pipeline_mode<synchronous>, transform_indices = @transform_4, window_bounds = array<i64: 1, 128>}, {pipeline_mode = #tpu.pipeline_mode<synchronous>, transform_indices = @transform_5, window_bounds = array<i64: 128, 128>}, {pipeline_mode = #tpu.pipeline_mode<synchronous>, transform_indices = @transform_6, window_bounds = array<i64: 1, 128>}, {transform_indices = @transform_7, window_bounds = array<i64: 8, 128>}]} {
    %c0 = arith.constant 0 : index
    %c0_0 = arith.constant 0 : index
    %0 = vector.load %arg1[%c0, %c0_0] : memref<8x16xf32, #tpu.memory_space<vmem>>, vector<8x16xf32>
    %c0_1 = arith.constant 0 : index
    %c0_2 = arith.constant 0 : index
    %1 = vector.load %arg2[%c0_1, %c0_2] : memref<16x128xf32, #tpu.memory_space<vmem>>, vector<16x128xf32>
    %cst = arith.constant dense<0.000000e+00> : vector<8x128xf32>
    %2 = tpu.matmul %0, %1, %cst {dimension_numbers = #tpu.dot_dimension_numbers<[1], [0], [0], [1], [0, 0, 1, 1], [], []>} : vector<8x16xf32>, vector<16x128xf32>, vector<8x128xf32> -> vector<8x128xf32>
    %c0_3 = arith.constant 0 : index
    %c0_4 = arith.constant 0 : index
    %3 = vector.load %arg3[%c0_3, %c0_4] : memref<1x128xf32, #tpu.memory_space<vmem>>, vector<1x128xf32>
    %4 = vector.broadcast %3 : vector<1x128xf32> to vector<8x128xf32>
    %5 = arith.addf %2, %4 : vector<8x128xf32>
    %cst_5 = arith.constant 0.000000e+00 : f32
    %6 = vector.broadcast %cst_5 : f32 to vector<8x128xf32>
    %7 = arith.maximumf %5, %6 : vector<8x128xf32>
    %c0_6 = arith.constant 0 : index
    %c0_7 = arith.constant 0 : index
    %8 = vector.load %arg4[%c0_6, %c0_7] : memref<128x128xf32, #tpu.memory_space<vmem>>, vector<128x128xf32>
    %cst_8 = arith.constant dense<0.000000e+00> : vector<8x128xf32>
    %9 = tpu.matmul %7, %8, %cst_8 {dimension_numbers = #tpu.dot_dimension_numbers<[1], [0], [0], [1], [0, 0, 1, 1], [], []>} : vector<8x128xf32>, vector<128x128xf32>, vector<8x128xf32> -> vector<8x128xf32>
    %c0_9 = arith.constant 0 : index
    %c0_10 = arith.constant 0 : index
    %10 = vector.load %arg5[%c0_9, %c0_10] : memref<1x128xf32, #tpu.memory_space<vmem>>, vector<1x128xf32>
    %11 = vector.broadcast %10 : vector<1x128xf32> to vector<8x128xf32>
    %12 = arith.addf %9, %11 : vector<8x128xf32>
    %13 = tpu.iota {dimensions = array<i32: 1>} : vector<8x128xi32>
    %c32_i32 = arith.constant 32 : i32
    %14 = vector.broadcast %c32_i32 : i32 to vector<8x128xi32>
    %15 = arith.cmpi slt, %13, %14 : vector<8x128xi32>
    %16 = math.tanh %12 : vector<8x128xf32>
    %cst_11 = arith.constant 0.000000e+00 : f32
    %17 = vector.broadcast %cst_11 : f32 to vector<8x128xf32>
    %18 = arith.maximumf %12, %17 : vector<8x128xf32>
    %19 = arith.select %15, %16, %18 : vector<8x128xi1>, vector<8x128xf32>
    %c0_12 = arith.constant 0 : index
    %c0_13 = arith.constant 0 : index
    %20 = vector.load %arg6[%c0_12, %c0_13] : memref<128x128xf32, #tpu.memory_space<vmem>>, vector<128x128xf32>
    %cst_14 = arith.constant dense<0.000000e+00> : vector<8x128xf32>
    %21 = tpu.matmul %19, %20, %cst_14 {dimension_numbers = #tpu.dot_dimension_numbers<[1], [0], [0], [1], [0, 0, 1, 1], [], []>} : vector<8x128xf32>, vector<128x128xf32>, vector<8x128xf32> -> vector<8x128xf32>
    %c0_15 = arith.constant 0 : index
    %c0_16 = arith.constant 0 : index
    %22 = vector.load %arg7[%c0_15, %c0_16] : memref<1x128xf32, #tpu.memory_space<vmem>>, vector<1x128xf32>
    %23 = vector.broadcast %22 : vector<1x128xf32> to vector<8x128xf32>
    %24 = arith.addf %21, %23 : vector<8x128xf32>
    %c0_17 = arith.constant 0 : index
    %c0_18 = arith.constant 0 : index
    %25 = vector.load %arg8[%c0_17, %c0_18] : memref<8x128xf32, #tpu.memory_space<vmem>>, vector<8x128xf32>
    tpu.vector_store %arg8[%c0_17, %c0_18], %24 {strides = array<i32>} : memref<8x128xf32, #tpu.memory_space<vmem>>, vector<8x128xf32>,
    return
  }
  func.func @transform_0(%arg0: i32) -> (i32, i32) {
    %c0_i32 = arith.constant 0 : i32
    %c0_i32_0 = arith.constant 0 : i32
    return %arg0, %c0_i32 : i32, i32
  }
  func.func @transform_1(%arg0: i32) -> (i32, i32) {
    %c0_i32 = arith.constant 0 : i32
    %c0_i32_0 = arith.constant 0 : i32
    %c0_i32_1 = arith.constant 0 : i32
    return %c0_i32, %c0_i32_0 : i32, i32
  }
  func.func @transform_2(%arg0: i32) -> (i32, i32) {
    %c0_i32 = arith.constant 0 : i32
    %c0_i32_0 = arith.constant 0 : i32
    %c0_i32_1 = arith.constant 0 : i32
    return %c0_i32, %c0_i32_0 : i32, i32
  }
  func.func @transform_3(%arg0: i32) -> (i32, i32) {
    %c0_i32 = arith.constant 0 : i32
    %c0_i32_0 = arith.constant 0 : i32
    %c0_i32_1 = arith.constant 0 : i32
    return %c0_i32, %c0_i32_0 : i32, i32
  }
  func.func @transform_4(%arg0: i32) -> (i32, i32) {
    %c0_i32 = arith.constant 0 : i32
    %c0_i32_0 = arith.constant 0 : i32
    %c0_i32_1 = arith.constant 0 : i32
    return %c0_i32, %c0_i32_0 : i32, i32
  }
  func.func @transform_5(%arg0: i32) -> (i32, i32) {
    %c0_i32 = arith.constant 0 : i32
    %c0_i32_0 = arith.constant 0 : i32
    %c0_i32_1 = arith.constant 0 : i32
    return %c0_i32, %c0_i32_0 : i32, i32
  }
  func.func @transform_6(%arg0: i32) -> (i32, i32) {
    %c0_i32 = arith.constant 0 : i32
    %c0_i32_0 = arith.constant 0 : i32
    %c0_i32_1 = arith.constant 0 : i32
    return %c0_i32, %c0_i32_0 : i32, i32
  }
  func.func @transform_7(%arg0: i32) -> (i32, i32) {
    %c0_i32 = arith.constant 0 : i32
    %c0_i32_0 = arith.constant 0 : i32
    return %arg0, %c0_i32 : i32, i32
  }
}

</mosaic_0001>

<bundles_post_ra>
// kernel: actor_critic_forward.1
= control target key start
LH: loop header
LB: loop body
LE: loop exit
PB: predicated region body
PF: predicated region fallthrough
CT: control target
= control target key end

     0   :  { %12 = vsyncpa [#allocation3], 0  ;;  %s776_s0 = inlined_call_operand.hbm [shape: f32[8,16], index: 0, kind: input, shape index: {}]   ;;  %s777_s1 = inlined_call_operand.hbm [shape: f32[16,128], index: 1, kind: input, shape index: {}]   ;;  %s778_s2 = inlined_call_operand.vmem [shape: f32[1,128], index: 2, kind: input, shape index: {}]   ;;  %s779_s3 = inlined_call_operand.hbm [shape: f32[128,128], index: 3, kind: input, shape index: {}]   ;;  %s780_s4 = inlined_call_operand.vmem [shape: f32[1,128], index: 4, kind: input, shape index: {}]   ;;  %s781_s5 = inlined_call_operand.hbm [shape: f32[128,128], index: 5, kind: input, shape index: {}]   ;;  %s782_s6 = inlined_call_operand.vmem [shape: f32[1,128], index: 6, kind: input, shape index: {}]   ;;  %s783_s7 = inlined_call_operand.vmem [shape: f32[8,128], index: 7, kind: output, shape index: {}]  }
   0x1   :  { %13 = vsyncpa [#allocation5], 0 }
   0x2   :  { %14 = vsyncpa [#allocation8], 0  ;;  %s638_s24 = smov [#allocation4]   ;;  %s544_s28 = scalar_lea.hbm %s777_s1, 256 }
   0x3   :  { %s30_s25 = sshll.u32 %s638_s24, 4  ;;  %p545_p0 = scmp.ne.s32.totalorder %s777_s1, %s544_s28  ;;  %s31_s25 = int_to_ptr.vmem [resolvable:$true] %s30_s25 }
   0x4   :  { %p548_p1 = scmp.lt.u32.totalorder %s544_s28, %s777_s1 }
   0x6   :  { %p550_p2 = pnand %p548_p1, %p545_p0 }
   0x8   :  { %553 = shalt.err (!%p550_p2)
}
   0x9   :  { %s554_s10 = scalar_lea.vmem %s31_s25, 256  ;;  %p559_p4 = scmp.lt.s32.totalorder %s31_s25, %s31_s25 }
   0xa   :  { %p555_p3 = scmp.ne.s32.totalorder %s31_s25, %s554_s10  ;;  %p560_p5 = scmp.lt.s32.totalorder %s554_s10, %s554_s10 }
   0xc   :  { %p561_p6 = por %p560_p5, %p559_p4 }
   0xe   :  { %p562_p7 = pnand %p561_p6, %p555_p3 }
  0x10   :  { %565 = shalt.err (!%p562_p7)
}
  0x11   :  { %s639_s11 = smov 128   ;;  %s640_s12 = smov 8  }
  0x12   :  { %36 = dma.hbm_to_vmem [thread:$0]  %s777_s1, 256, %s31_s25, [#allocation5], %s639_s11, %s639_s11, %s640_s12  }
  0x13   :  { %s641_s15 = smov [#allocation2]   ;;  %s642_s17 = smov [#allocation6]  }
  0x14   :  { %s21_s16 = sshll.u32 %s641_s15, 4  ;;  %s44_s18 = sshll.u32 %s642_s17, 4  ;;  %s22_s16 = int_to_ptr.vmem [resolvable:$true] %s21_s16  ;;  %s45_s18 = int_to_ptr.vmem [resolvable:$true] %s44_s18 }
  0x15   :  { %s566_s21 = scalar_lea.hbm %s776_s0, 128 }
  0x16   :  { %p567_p8 = scmp.ne.s32.totalorder %s776_s0, %s566_s21  ;;  %p570_p9 = scmp.lt.u32.totalorder %s566_s21, %s776_s0 }
  0x18   :  { %p572_p10 = pnand %p570_p9, %p567_p8 }
  0x1a   :  { %575 = shalt.err (!%p572_p10)
}
  0x1b   :  { %s576_s1 = scalar_lea.vmem %s22_s16, 128  ;;  %p581_p12 = scmp.lt.s32.totalorder %s22_s16, %s22_s16 }
  0x1c   :  { %p577_p11 = scmp.ne.s32.totalorder %s22_s16, %s576_s1  ;;  %p582_p13 = scmp.lt.s32.totalorder %s576_s1, %s576_s1 }
  0x1e   :  { %p583_p0 = por %p582_p13, %p581_p12 }
  0x20   :  { %p584_p1 = pnand %p583_p0, %p577_p11 }
  0x22   :  { %587 = shalt.err (!%p584_p1)
}
  0x23   :  { %24 = dma.hbm_to_vmem [thread:$0]  %s776_s0, 128, %s22_s16, [#allocation3]  }
  0x24   :  { %s588_s30 = scalar_lea.hbm %s779_s3, 2048 }
  0x25   :  { %p589_p2 = scmp.ne.s32.totalorder %s779_s3, %s588_s30  ;;  %p592_p3 = scmp.lt.u32.totalorder %s588_s30, %s779_s3 }
  0x27   :  { %p594_p4 = pnand %p592_p3, %p589_p2 }
  0x29   :  { %597 = shalt.err (!%p594_p4)
}
  0x2a   :  { %s598_s14 = scalar_lea.vmem %s45_s18, 2048  ;;  %p603_p6 = scmp.lt.s32.totalorder %s45_s18, %s45_s18 }
  0x2b   :  { %p599_p5 = scmp.ne.s32.totalorder %s45_s18, %s598_s14  ;;  %p604_p7 = scmp.lt.s32.totalorder %s598_s14, %s598_s14 }
  0x2d   :  { %p605_p8 = por %p604_p7, %p603_p6 }
  0x2f   :  { %p606_p9 = pnand %p605_p8, %p599_p5 }
  0x31   :  { %609 = shalt.err (!%p606_p9)
}
  0x32   :  { %50 = dma.hbm_to_vmem [thread:$0]  %s779_s3, 2048, %s45_s18, [#allocation5], %s639_s11, %s639_s11, %s640_s12  }
  0x33   :  { %s643_s16 = smov [#allocation7]   ;;  %s610_s21 = scalar_lea.hbm %s781_s5, 2048 }
  0x34   :  { %s58_s17 = sshll.u32 %s643_s16, 4  ;;  %p611_p10 = scmp.ne.s32.totalorder %s781_s5, %s610_s21  ;;  %s59_s17 = int_to_ptr.vmem [resolvable:$true] %s58_s17 }
  0x35   :  { %p614_p11 = scmp.lt.u32.totalorder %s610_s21, %s781_s5 }
  0x37   :  { %p616_p12 = pnand %p614_p11, %p611_p10 }
  0x39   :  { %619 = shalt.err (!%p616_p12)
}
  0x3a   :  { %s620_s1 = scalar_lea.vmem %s59_s17, 2048  ;;  %p625_p0 = scmp.lt.s32.totalorder %s59_s17, %s59_s17 }
  0x3b   :  { %p621_p13 = scmp.ne.s32.totalorder %s59_s17, %s620_s1  ;;  %p626_p1 = scmp.lt.s32.totalorder %s620_s1, %s620_s1 }
  0x3d   :  { %p627_p2 = por %p626_p1, %p625_p0 }
  0x3f   :  { %p628_p3 = pnand %p627_p2, %p621_p13 }
  0x41   :  { %631 = shalt.err (!%p628_p3)
}
  0x42   :  { %64 = dma.hbm_to_vmem [thread:$0]  %s781_s5, 2048, %s59_s17, [#allocation8], %s639_s11, %s639_s11, %s640_s12  }
  0x43   :  { %632 = dma.done.wait [#allocation3], 128  }
  0x44   :  { %633 = vsyncadd [#allocation3], 4294967168 }
  0x45   :  { %634 = dma.done.wait [#allocation5], 2304  }
  0x46   :  { %635 = vsyncadd [#allocation5], 4294964992 }
  0x47   :  { %636 = dma.done.wait [#allocation8], 2048  }
  0x48   :  { %637 = vsyncadd [#allocation8], 4294965248  ;;  %v644_v0 = vmov 0.0|0.0   ;;  %vm645_vm0 = vmmov 0   ;;  %v646_v1 = vmov 0.0   ;;  %v80_v2 = vld [vmem:[#allocation4] sm:$0xff]  ;;  %v257_v63 = vlaneseq }
  0x49   :  { %482 = vmatprep.subr.bf16.mxu0 %v644_v0  ;;  %409 = vmatprep.mubr.msk.f32.mxu0 %vm645_vm0, %v646_v1  ;;  %v81_v3 = vld [vmem:[#allocation4 + $0x8] sm:$0xff]  ;;  %v164_v5 = vld [vmem:[#allocation6] sm:$0xff]  ;;  %v165_v6 = vld [vmem:[#allocation6 + $0x8] sm:$0xff]  ;;  %vm89_vm1 = vcmask 130048  }
  0x4a   :  { %485 = vmatprep.subr.bf16.mxu1 %v644_v0  ;;  %444 = vmatprep.mubr.msk.f32.mxu1 %vm645_vm0, %v646_v1  ;;  %v483_v4 = vpack.c.bf16 %v81_v3, %v80_v2  ;;  %v166_v7 = vld [vmem:[#allocation6 + $0x10] sm:$0xff]  ;;  %v486_v8 = vpack.c.bf16 %v165_v6, %v164_v5  ;;  %v167_v9 = vld [vmem:[#allocation6 + $0x18] sm:$0xff]  ;;  %v79_v10 = vld [vmem:[#allocation2] sm:$0xff] }
  0x4b   :  { %v489_v11 = vpack.c.bf16 %v167_v9, %v166_v7  ;;  %v168_v12 = vld [vmem:[#allocation6 + $0x20] sm:$0xff]  ;;  %v169_v13 = vld [vmem:[#allocation6 + $0x28] sm:$0xff]  ;;  %v170_v15 = vld [vmem:[#allocation6 + $0x30] sm:$0xff] }
  0x4c   :  { %484 = vmatpush3.bf16.msra.mxu0 %v483_v4  ;;  %487 = vmatpush3.bf16.msra.mxu1 %v486_v8  ;;  %v492_v14 = vpack.c.bf16 %v169_v13, %v168_v12  ;;  %v171_v16 = vld [vmem:[#allocation6 + $0x38] sm:$0xff]  ;;  %v172_v18 = vld [vmem:[#allocation6 + $0x40] sm:$0xff]  ;;  %v173_v19 = vld [vmem:[#allocation6 + $0x48] sm:$0xff] }
  0x4d   :  { %509 = vmatprep.subr.bf16.mxu0 %v644_v0  ;;  %488 = vmatprep.subr.bf16.mxu1 %v644_v0  ;;  %v495_v17 = vpack.c.bf16 %v171_v16, %v170_v15  ;;  %v498_v20 = vpack.c.bf16 %v173_v19, %v172_v18  ;;  %v174_v21 = vld [vmem:[#allocation6 + $0x50] sm:$0xff]  ;;  %v175_v22 = vld [vmem:[#allocation6 + $0x58] sm:$0xff]  ;;  %v176_v24 = vld [vmem:[#allocation6 + $0x60] sm:$0xff] }
  0x4e   :  { %v501_v23 = vpack.c.bf16 %v175_v22, %v174_v21  ;;  %v177_v25 = vld [vmem:[#allocation6 + $0x68] sm:$0xff]  ;;  %v178_v27 = vld [vmem:[#allocation6 + $0x70] sm:$0xff]  ;;  %v179_v28 = vld [vmem:[#allocation6 + $0x78] sm:$0xff] }
  0x4f   :  { %410 = vmatmul.mubr.msk.f32.vlgmr.msra.gmra.mrb[0].mxu0 %vm89_vm1, %v79_v10  ;;  %v504_v26 = vpack.c.bf16 %v177_v25, %v176_v24  ;;  %v507_v29 = vpack.c.bf16 %v179_v28, %v178_v27  ;;  %v263_v30 = vld [vmem:[#allocation7] sm:$0xff]  ;;  %v264_v31 = vld [vmem:[#allocation7 + $0x8] sm:$0xff]  ;;  %v265_v32 = vld [vmem:[#allocation7 + $0x10] sm:$0xff] }
  0x50   :  { %479 = vmatprep.mubr.msk.f32.mxu0 %vm645_vm0, %v646_v1  ;;  %490 = vmatpush3.bf16.msra.mxu1 %v489_v11  ;;  %v510_v33 = vpack.c.bf16 %v264_v31, %v263_v30  ;;  %v266_v34 = vld [vmem:[#allocation7 + $0x18] sm:$0xff]  ;;  %v267_v36 = vld [vmem:[#allocation7 + $0x20] sm:$0xff]  ;;  %v268_v37 = vld [vmem:[#allocation7 + $0x28] sm:$0xff]  ;;  %v258_v1 = vand.u32 127, %v257_v63 }
  0x51   :  { %491 = vmatprep.subr.bf16.mxu1 %v644_v0  ;;  %v513_v35 = vpack.c.bf16 %v266_v34, %v265_v32  ;;  %v516_v38 = vpack.c.bf16 %v268_v37, %v267_v36  ;;  %v269_v39 = vld [vmem:[#allocation7 + $0x30] sm:$0xff]  ;;  %v270_v40 = vld [vmem:[#allocation7 + $0x38] sm:$0xff]  ;;  %v364_v42 = vld [vmem:[%s778_s2] ss:$0 sm:$0xff] }
  0x52   :  { %511 = vmatpush3.bf16.msra.mxu0 %v510_v33  ;;  %v519_v41 = vpack.c.bf16 %v270_v40, %v269_v39  ;;  %v271_v47 = vld [vmem:[#allocation7 + $0x40] sm:$0xff]  ;;  %v272_v48 = vld [vmem:[#allocation7 + $0x48] sm:$0xff]  ;;  %v273_v50 = vld [vmem:[#allocation7 + $0x50] sm:$0xff]  ;;  %vm259_vm2 = vcmp.lt.s32.totalorder %v258_v1, 32 }
  0x53   :  { %512 = vmatprep.subr.bf16.mxu0 %v644_v0  ;;  %v522_v49 = vpack.c.bf16 %v272_v48, %v271_v47  ;;  %v274_v51 = vld [vmem:[#allocation7 + $0x58] sm:$0xff]  ;;  %v275_v53 = vld [vmem:[#allocation7 + $0x60] sm:$0xff]  ;;  %v276_v54 = vld [vmem:[#allocation7 + $0x68] sm:$0xff] }
  0x54   :  { %493 = vmatpush3.bf16.msra.mxu1 %v492_v14  ;;  %v525_v52 = vpack.c.bf16 %v274_v51, %v273_v50  ;;  %v528_v55 = vpack.c.bf16 %v276_v54, %v275_v53  ;;  %v277_v56 = vld [vmem:[#allocation7 + $0x70] sm:$0xff]  ;;  %v278_v57 = vld [vmem:[#allocation7 + $0x78] sm:$0xff]  ;;  %v366_v59 = vld [vmem:[%s780_s4] ss:$0 sm:$0xff] }
  0x55   :  { %494 = vmatprep.subr.bf16.mxu1 %v644_v0  ;;  %v531_v58 = vpack.c.bf16 %v278_v57, %v277_v56 }
  0x56   :  { %514 = vmatpush3.bf16.msra.mxu0 %v513_v35 }
  0x57   :  { %515 = vmatprep.subr.bf16.mxu0 %v644_v0 }
  0x58   :  { %496 = vmatpush3.bf16.msra.mxu1 %v495_v17 }
  0x59   :  { %497 = vmatprep.subr.bf16.mxu1 %v644_v0 }
  0x5a   :  { %517 = vmatpush3.bf16.msra.mxu0 %v516_v38 }
  0x5b   :  { %518 = vmatprep.subr.bf16.mxu0 %v644_v0 }
  0x5c   :  { %499 = vmatpush3.bf16.msra.mxu1 %v498_v20 }
  0x5d   :  { %500 = vmatprep.subr.bf16.mxu1 %v644_v0 }
  0x5e   :  { %520 = vmatpush3.bf16.msra.mxu0 %v519_v41 }
  0x5f   :  { %521 = vmatprep.subr.bf16.mxu0 %v644_v0 }
  0x60   :  { %502 = vmatpush3.bf16.msra.mxu1 %v501_v23 }
  0x61   :  { %503 = vmatprep.subr.bf16.mxu1 %v644_v0 }
  0x62   :  { %523 = vmatpush3.bf16.msra.mxu0 %v522_v49 }
  0x63   :  { %524 = vmatprep.subr.bf16.mxu0 %v644_v0 }
  0x64   :  { %505 = vmatpush3.bf16.msra.mxu1 %v504_v26 }
  0x65   :  { %506 = vmatprep.subr.bf16.mxu1 %v644_v0 }
  0x66   :  { %526 = vmatpush3.bf16.msra.mxu0 %v525_v52 }
  0x67   :  { %527 = vmatprep.subr.bf16.mxu0 %v644_v0 }
  0x68   :  { %508 = vmatpush3.bf16.msra.mxu1 %v507_v29 }
  0x6a   :  { %529 = vmatpush3.bf16.msra.mxu0 %v528_v55 }
  0x6b   :  { %530 = vmatprep.subr.bf16.mxu0 %v644_v0  ;;  %v367_v0 = vld [vmem:[%s782_s6] ss:$0 sm:$0xff] }
  0x6e   :  { %532 = vmatpush3.bf16.msra.mxu0 %v531_v58 }
 0x122   :  { %v159_v43 = vpop.f32.mrb[0].mxu0 }
 0x123   :  { %v160_v44 = vadd.f32 %v364_v42, %v159_v43  ;;  %v411_v45 = vpop.f32.mrb[1].mxu0 }
 0x125   :  { %v163_v46 = vmax.f32 %v160_v44, 0.0 }
 0x127   :  { %445 = vmatmul.mubr.f32.vlgmr.msra.gmra.mrb[0].mxu1 %v163_v46 }
 0x1fa   :  { %v253_v60 = vpop.f32.mrb[0].mxu1 }
 0x1fb   :  { %v254_v61 = vadd.f32 %v366_v59, %v253_v60  ;;  %v446_v62 = vpop.f32.mrb[1].mxu1 }
 0x1fd   :  { %542 = vtanh.f32 %v254_v61  ;;  %v261_v2 = vmax.f32 %v254_v61, 0.0 }
 0x207   :  { %v543_v3 = vpop.eup %542 }
 0x208   :  { %v262_v4 = vsel %vm259_vm2, %v543_v3, %v261_v2 }
 0x209   :  { %480 = vmatmul.mubr.f32.vlgmr.msra.gmra.mrb[2].mxu0 %v262_v4 }
 0x2dc   :  { %v352_v5 = vpop.f32.mrb[2].mxu0 }
 0x2dd   :  { %v353_v6 = vadd.f32 %v367_v0, %v352_v5  ;;  %v481_v7 = vpop.f32.mrb[3].mxu0 }
 0x2df   :  { %356 = vst [vmem:[%s783_s7] sm:$0xff] %v353_v6 }
 0x2e0   :  { %361 = vsyncpa [#allocation3], 1 }
 0x2e1   :  { %362 = vsyncpa [#allocation5], 1 }
 0x2e2   :  { %363 = vsyncpa [#allocation8], 1 }

</bundles_post_ra>
